<compile_context>
chip_gen: v6e
topology: v6e:2x2x1
jax: 0.10.0
libtpu: 0.0.40
codegen_flags: <defaults>
</compile_context>

<pallas_src>
import math

import jax
import jax.numpy as jnp
from jax.experimental import pallas as pl
from jax.experimental.pallas import tpu as pltpu


def _round_up(x, m):
    return (x + m - 1) // m * m


def _vit_time_embed_kernel(t_ref, freqs_ref, phases_ref,
                           w1_ref, b1_ref, w2_ref, b2_ref, o_ref):
    # FourierEmbedding: cos(t * freqs + phases) * sqrt(2), f32 on VPU/EUP.
    t = t_ref[...].astype(jnp.float32)                       # [bt, 1]
    y = t * freqs_ref[...] + phases_ref[...]                 # [bt, Dp]
    fourier = jnp.cos(y) * jnp.float32(math.sqrt(2.0))       # [bt, Dp]

    # TimestepEmbedding.linear_1 (MXU, f32 accumulate) + SiLU.
    w1 = w1_ref[...]
    h = jnp.dot(fourier.astype(w1.dtype), w1,
                preferred_element_type=jnp.float32) + b1_ref[...]    # [bt, Ep]
    # SiLU via tanh-based sigmoid: single EUP op per element, numerically
    # exact in both tails (no exp overflow, no approx reciprocal).
    h = h * (0.5 * jnp.tanh(0.5 * h) + 0.5)

    # TimestepEmbedding.linear_2 (MXU, f32 accumulate).
    w2 = w2_ref[...]
    out = jnp.dot(h.astype(w2.dtype), w2,
                  preferred_element_type=jnp.float32) + b2_ref[...]  # [bt, Ep]
    o_ref[...] = out.astype(o_ref.dtype)


def prepare_vit_time_embedding_params(freqs, phases, w1, b1, w2, b2, *,
                                      mxu_dtype=jnp.float32):
    """Pad module parameters to lane-dense tiles ONCE (call at init, not per step).

    w1: [D, E] (input-major, transpose of PyTorch's [out, in]); b1: [E]
    w2: [E, E] (input-major);                                   b2: [E]

    Padded D columns of freqs/phases are zero -> their fourier features hit
    zero rows of w1; padded E columns are zero everywhere -> SiLU(0)=0 there,
    so padding never leaks into the real [:B, :E] output.
    """
    D = freqs.shape[0]
    E = b1.shape[0]
    Dp = _round_up(D, 128)
    Ep = _round_up(E, 128)
    f32 = jnp.float32

    freqs_p = jnp.pad(freqs.astype(f32), (0, Dp - D)).reshape(1, Dp)
    phases_p = jnp.pad(phases.astype(f32), (0, Dp - D)).reshape(1, Dp)
    w1_p = jnp.pad(w1.astype(f32), ((0, Dp - D), (0, Ep - E))).astype(mxu_dtype)
    b1_p = jnp.pad(b1.astype(f32), (0, Ep - E)).reshape(1, Ep)
    w2_p = jnp.pad(w2.astype(f32), ((0, Ep - E), (0, Ep - E))).astype(mxu_dtype)
    b2_p = jnp.pad(b2.astype(f32), (0, Ep - E)).reshape(1, Ep)

    return dict(freqs=freqs_p, phases=phases_p,
                w1=w1_p, b1=b1_p, w2=w2_p, b2=b2_p,
                dim=D, embed_dim=E)


def vit_time_embedding(timesteps, params, *, block_b=None):
    """timesteps: [B] -> [B, E] float32, using pre-padded `params`."""
    B = timesteps.shape[0]
    E = params["embed_dim"]
    Dp = params["freqs"].shape[1]
    Ep = params["b1"].shape[1]
    f32 = jnp.float32

    # B tiling: multiple of 8 (sublane rule).  For B >= 16, guarantee >= 2 grid
    # steps so the "parallel" axis shards across v7x's two TensorCores; cap at
    # 1024 so fewer/fatter steps amortize per-step overhead on v5e/v6e while
    # tiles (output block_b x Ep x 4B, double-buffered) stay well inside VMEM.
    if block_b is None:
        if B >= 16:
            block_b = min(1024, _round_up(pl.cdiv(B, 2), 8))
        else:
            block_b = _round_up(max(B, 1), 8)
    block_b = max(8, _round_up(block_b, 8))
    Bp = _round_up(B, block_b)
    grid = (Bp // block_b,)

    # Only the tiny timesteps vector is padded per call.
    # TODO(synk): the (block_b, 1) timesteps block lane-pads to block_b x 128
    # in VMEM; a lane-dense (1, block_b) layout + in-kernel transpose would
    # save VMEM headroom on v7x at very large block_b.
    t2 = jnp.pad(timesteps.astype(f32), (0, Bp - B)).reshape(Bp, 1)

    # Constant-index blocks: resident, single-buffered (halves weight VMEM).
    def const_spec(shape):
        return pl.BlockSpec(shape, lambda i: (0, 0),
                            pipeline_mode=pl.Buffered(1))

    w_bytes = (params["w1"].size * params["w1"].dtype.itemsize
               + params["w2"].size * params["w2"].dtype.itemsize)
    cost = pl.CostEstimate(
        flops=2 * Bp * Ep * (Dp + Ep),
        transcendentals=Bp * (Dp + Ep),          # cos + tanh per element
        bytes_accessed=(Bp * 4 + 2 * Dp * 4 + 2 * Ep * 4
                        + w_bytes + Bp * Ep * 4),
    )

    out = pl.pallas_call(
        _vit_time_embed_kernel,
        out_shape=jax.ShapeDtypeStruct((Bp, Ep), f32),
        grid_spec=pltpu.PrefetchScalarGridSpec(
            num_scalar_prefetch=0,
            grid=grid,
            in_specs=[
                pl.BlockSpec((block_b, 1), lambda i: (i, 0)),   # timesteps
                const_spec((1, Dp)),                            # freqs
                const_spec((1, Dp)),                            # phases
                const_spec((Dp, Ep)),                           # w1
                const_spec((1, Ep)),                            # b1
                const_spec((Ep, Ep)),                           # w2
                const_spec((1, Ep)),                            # b2
            ],
            out_specs=pl.BlockSpec((block_b, Ep), lambda i: (i, 0)),
        ),
        compiler_params=pltpu.CompilerParams(
            dimension_semantics=("parallel",)),
        cost_estimate=cost,
    )(t2, params["freqs"], params["phases"],
      params["w1"], params["b1"], params["w2"], params["b2"])

    # Skip the post-kernel copy when no padding was needed.
    if Bp == B and Ep == E:
        return out
    return out[:B, :E]


def vit_time_embedding_oneshot(timesteps, freqs, phases, w1, b1, w2, b2,
                               *, block_b=None, mxu_dtype=jnp.float32):
    """Convenience wrapper (pads every call — prefer prepare_* + vit_time_embedding)."""
    params = prepare_vit_time_embedding_params(
        freqs, phases, w1, b1, w2, b2, mxu_dtype=mxu_dtype)
    return vit_time_embedding(timesteps, params, block_b=block_b)


def _reference(timesteps, freqs, phases, w1, b1, w2, b2):
    t = timesteps.astype(jnp.float32)
    y = jnp.cos(t[..., None] * freqs + phases) * jnp.float32(math.sqrt(2.0))
    h = y @ w1 + b1
    h = h * jax.nn.sigmoid(h)
    return h @ w2 + b2


if __name__ == "__main__":
    # Small shapes consistent with ViTTimeEmbedding(dim=D, time_embed_dim=E).
    B, D, E = 8, 32, 64

    key = jax.random.PRNGKey(0)
    k_t, k_f, k_p, k_w1, k_b1, k_w2, k_b2 = jax.random.split(key, 7)

    timesteps = jax.random.uniform(k_t, (B,), jnp.float32) * 1000.0

    # FourierEmbedding buffers (deterministic synthetic init).
    freqs = 2.0 * jnp.pi * jax.random.normal(k_f, (D,), jnp.float32)
    phases = 2.0 * jnp.pi * jax.random.uniform(k_p, (D,), jnp.float32)

    # TimestepEmbedding parameters (Linear weights stored [in, out]).
    w1 = jax.random.normal(k_w1, (D, E), jnp.float32) * (1.0 / math.sqrt(D))
    b1 = jax.random.normal(k_b1, (E,), jnp.float32) * 0.01
    w2 = jax.random.normal(k_w2, (E, E), jnp.float32) * (1.0 / math.sqrt(E))
    b2 = jax.random.normal(k_b2, (E,), jnp.float32) * 0.01

    # Padding hoisted out of the per-call hot path (done once at init).
    params = prepare_vit_time_embedding_params(freqs, phases, w1, b1, w2, b2)

    out = vit_time_embedding(timesteps, params)
    out = jax.block_until_ready(out)

    ref = _reference(timesteps, freqs, phases, w1, b1, w2, b2)
    assert out.shape == (B, E)
    # Tolerance sized for f32 MXU matmuls vs. the default-precision XLA
    # reference (outputs are O(1)); the SiLU itself is now exact (tanh form).
    assert jnp.allclose(out, ref, atol=5e-3, rtol=5e-3), float(
        jnp.max(jnp.abs(out - ref)))

    print("KERNEL_OK")
</pallas_src>

<mosaic_0001>
module attributes {stable_mosaic.version = 11 : i64} {
  func.func @_vit_time_embed_kernel(%arg0: i32, %arg1: memref<8x1xf32, #tpu.memory_space<vmem>>, %arg2: memref<1x128xf32, #tpu.memory_space<vmem>>, %arg3: memref<1x128xf32, #tpu.memory_space<vmem>>, %arg4: memref<128x128xf32, #tpu.memory_space<vmem>>, %arg5: memref<1x128xf32, #tpu.memory_space<vmem>>, %arg6: memref<128x128xf32, #tpu.memory_space<vmem>>, %arg7: memref<1x128xf32, #tpu.memory_space<vmem>>, %arg8: memref<8x128xf32, #tpu.memory_space<vmem>>) attributes {dimension_semantics = [#tpu.dimension_semantics<parallel>], iteration_bounds = array<i64: 1>, scalar_prefetch = 0 : i64, scratch_operands = 0 : i64, tpu.core_type = #tpu.core_type<tc>, window_params = [{transform_indices = @transform_0, window_bounds = array<i64: 8, 1>}, {pipeline_mode = #tpu.pipeline_mode<synchronous>, transform_indices = @transform_1, window_bounds = array<i64: 1, 128>}, {pipeline_mode = #tpu.pipeline_mode<synchronous>, transform_indices = @transform_2, window_bounds = array<i64: 1, 128>}, {pipeline_mode = #tpu.pipeline_mode<synchronous>, transform_indices = @transform_3, window_bounds = array<i64: 128, 128>}, {pipeline_mode = #tpu.pipeline_mode<synchronous>, transform_indices = @transform_4, window_bounds = array<i64: 1, 128>}, {pipeline_mode = #tpu.pipeline_mode<synchronous>, transform_indices = @transform_5, window_bounds = array<i64: 128, 128>}, {pipeline_mode = #tpu.pipeline_mode<synchronous>, transform_indices = @transform_6, window_bounds = array<i64: 1, 128>}, {transform_indices = @transform_7, window_bounds = array<i64: 8, 128>}]} {
    %c0 = arith.constant 0 : index
    %c0_0 = arith.constant 0 : index
    %0 = vector.load %arg1[%c0, %c0_0] : memref<8x1xf32, #tpu.memory_space<vmem>>, vector<8x1xf32>
    %c0_1 = arith.constant 0 : index
    %c0_2 = arith.constant 0 : index
    %1 = vector.load %arg2[%c0_1, %c0_2] : memref<1x128xf32, #tpu.memory_space<vmem>>, vector<1x128xf32>
    %2 = vector.broadcast %0 : vector<8x1xf32> to vector<8x128xf32>
    %3 = vector.broadcast %1 : vector<1x128xf32> to vector<8x128xf32>
    %4 = arith.mulf %2, %3 : vector<8x128xf32>
    %c0_3 = arith.constant 0 : index
    %c0_4 = arith.constant 0 : index
    %5 = vector.load %arg3[%c0_3, %c0_4] : memref<1x128xf32, #tpu.memory_space<vmem>>, vector<1x128xf32>
    %6 = vector.broadcast %5 : vector<1x128xf32> to vector<8x128xf32>
    %7 = arith.addf %4, %6 : vector<8x128xf32>
    %8 = math.cos %7 : vector<8x128xf32>
    %cst = arith.constant 1.41421354 : f32
    %9 = vector.broadcast %cst : f32 to vector<8x128xf32>
    %10 = arith.mulf %8, %9 : vector<8x128xf32>
    %c0_5 = arith.constant 0 : index
    %c0_6 = arith.constant 0 : index
    %11 = vector.load %arg4[%c0_5, %c0_6] : memref<128x128xf32, #tpu.memory_space<vmem>>, vector<128x128xf32>
    %cst_7 = arith.constant dense<0.000000e+00> : vector<8x128xf32>
    %12 = tpu.matmul %10, %11, %cst_7 {dimension_numbers = #tpu.dot_dimension_numbers<[1], [0], [0], [1], [0, 0, 1, 1], [], []>} : vector<8x128xf32>, vector<128x128xf32>, vector<8x128xf32> -> vector<8x128xf32>
    %c0_8 = arith.constant 0 : index
    %c0_9 = arith.constant 0 : index
    %13 = vector.load %arg5[%c0_8, %c0_9] : memref<1x128xf32, #tpu.memory_space<vmem>>, vector<1x128xf32>
    %14 = vector.broadcast %13 : vector<1x128xf32> to vector<8x128xf32>
    %15 = arith.addf %12, %14 : vector<8x128xf32>
    %cst_10 = arith.constant 5.000000e-01 : f32
    %16 = vector.broadcast %cst_10 : f32 to vector<8x128xf32>
    %17 = arith.mulf %16, %15 : vector<8x128xf32>
    %18 = math.tanh %17 : vector<8x128xf32>
    %cst_11 = arith.constant 5.000000e-01 : f32
    %19 = vector.broadcast %cst_11 : f32 to vector<8x128xf32>
    %20 = arith.mulf %19, %18 : vector<8x128xf32>
    %cst_12 = arith.constant 5.000000e-01 : f32
    %21 = vector.broadcast %cst_12 : f32 to vector<8x128xf32>
    %22 = arith.addf %20, %21 : vector<8x128xf32>
    %23 = arith.mulf %15, %22 : vector<8x128xf32>
    %c0_13 = arith.constant 0 : index
    %c0_14 = arith.constant 0 : index
    %24 = vector.load %arg6[%c0_13, %c0_14] : memref<128x128xf32, #tpu.memory_space<vmem>>, vector<128x128xf32>
    %cst_15 = arith.constant dense<0.000000e+00> : vector<8x128xf32>
    %25 = tpu.matmul %23, %24, %cst_15 {dimension_numbers = #tpu.dot_dimension_numbers<[1], [0], [0], [1], [0, 0, 1, 1], [], []>} : vector<8x128xf32>, vector<128x128xf32>, vector<8x128xf32> -> vector<8x128xf32>
    %c0_16 = arith.constant 0 : index
    %c0_17 = arith.constant 0 : index
    %26 = vector.load %arg7[%c0_16, %c0_17] : memref<1x128xf32, #tpu.memory_space<vmem>>, vector<1x128xf32>
    %27 = vector.broadcast %26 : vector<1x128xf32> to vector<8x128xf32>
    %28 = arith.addf %25, %27 : vector<8x128xf32>
    %c0_18 = arith.constant 0 : index
    %c0_19 = arith.constant 0 : index
    %29 = vector.load %arg8[%c0_18, %c0_19] : memref<8x128xf32, #tpu.memory_space<vmem>>, vector<8x128xf32>
    tpu.vector_store %arg8[%c0_18, %c0_19], %28 {strides = array<i32>} : memref<8x128xf32, #tpu.memory_space<vmem>>, vector<8x128xf32>,
    return
  }
  func.func @transform_0(%arg0: i32) -> (i32, i32) {
    %c0_i32 = arith.constant 0 : i32
    %c0_i32_0 = arith.constant 0 : i32
    return %arg0, %c0_i32 : i32, i32
  }
  func.func @transform_1(%arg0: i32) -> (i32, i32) {
    %c0_i32 = arith.constant 0 : i32
    %c0_i32_0 = arith.constant 0 : i32
    %c0_i32_1 = arith.constant 0 : i32
    return %c0_i32, %c0_i32_0 : i32, i32
  }
  func.func @transform_2(%arg0: i32) -> (i32, i32) {
    %c0_i32 = arith.constant 0 : i32
    %c0_i32_0 = arith.constant 0 : i32
    %c0_i32_1 = arith.constant 0 : i32
    return %c0_i32, %c0_i32_0 : i32, i32
  }
  func.func @transform_3(%arg0: i32) -> (i32, i32) {
    %c0_i32 = arith.constant 0 : i32
    %c0_i32_0 = arith.constant 0 : i32
    %c0_i32_1 = arith.constant 0 : i32
    return %c0_i32, %c0_i32_0 : i32, i32
  }
  func.func @transform_4(%arg0: i32) -> (i32, i32) {
    %c0_i32 = arith.constant 0 : i32
    %c0_i32_0 = arith.constant 0 : i32
    %c0_i32_1 = arith.constant 0 : i32
    return %c0_i32, %c0_i32_0 : i32, i32
  }
  func.func @transform_5(%arg0: i32) -> (i32, i32) {
    %c0_i32 = arith.constant 0 : i32
    %c0_i32_0 = arith.constant 0 : i32
    %c0_i32_1 = arith.constant 0 : i32
    return %c0_i32, %c0_i32_0 : i32, i32
  }
  func.func @transform_6(%arg0: i32) -> (i32, i32) {
    %c0_i32 = arith.constant 0 : i32
    %c0_i32_0 = arith.constant 0 : i32
    %c0_i32_1 = arith.constant 0 : i32
    return %c0_i32, %c0_i32_0 : i32, i32
  }
  func.func @transform_7(%arg0: i32) -> (i32, i32) {
    %c0_i32 = arith.constant 0 : i32
    %c0_i32_0 = arith.constant 0 : i32
    return %arg0, %c0_i32 : i32, i32
  }
}

</mosaic_0001>

<bundles_post_ra>
// kernel: tpu_custom_call.1
= control target key start
LH: loop header
LB: loop body
LE: loop exit
PB: predicated region body
PF: predicated region fallthrough
CT: control target
= control target key end

     0   :  { %12 = vsyncpa [#allocation3], 0  ;;  %s725_s0 = inlined_call_operand.vmem [shape: f32[8,1], index: 0, kind: input, shape index: {}]   ;;  %s726_s1 = inlined_call_operand.vmem [shape: f32[1,128], index: 1, kind: input, shape index: {}]   ;;  %s727_s2 = inlined_call_operand.vmem [shape: f32[1,128], index: 2, kind: input, shape index: {}]   ;;  %s728_s3 = inlined_call_operand.hbm [shape: f32[128,128], index: 3, kind: input, shape index: {}]   ;;  %s729_s4 = inlined_call_operand.vmem [shape: f32[1,128], index: 4, kind: input, shape index: {}]   ;;  %s730_s5 = inlined_call_operand.hbm [shape: f32[128,128], index: 5, kind: input, shape index: {}]   ;;  %s731_s6 = inlined_call_operand.vmem [shape: f32[1,128], index: 6, kind: input, shape index: {}]   ;;  %s732_s7 = inlined_call_operand.hbm [shape: f32[8,128], index: 7, kind: output, shape index: {}]  }
   0x1   :  { %13 = vsyncpa [#allocation6], 0 }
   0x2   :  { %14 = vsyncpa [#allocation4], 0  ;;  %s592_s24 = smov [#allocation2]  }
   0x3   :  { %s26_s25 = sshll.u32 %s592_s24, 4  ;;  %s27_s25 = int_to_ptr.vmem [resolvable:$true] %s26_s25 }
   0x4   :  { %s534_s26 = scalar_lea.vmem %s27_s25, 2048  ;;  %p539_p1 = scmp.lt.s32.totalorder %s27_s25, %s27_s25 }
   0x5   :  { %p535_p0 = scmp.ne.s32.totalorder %s27_s25, %s534_s26  ;;  %p540_p2 = scmp.lt.s32.totalorder %s534_s26, %s534_s26 }
   0x7   :  { %p541_p3 = por %p540_p2, %p539_p1 }
   0x9   :  { %p542_p4 = pnand %p541_p3, %p535_p0 }
   0xb   :  { %545 = shalt.err (!%p542_p4)
}
   0xc   :  { %s593_s27 = smov 128   ;;  %s594_s28 = smov 8  }
   0xd   :  { %32 = dma.hbm_to_vmem [thread:$0]  %s728_s3, 2048, %s27_s25, [#allocation3], %s593_s27, %s593_s27, %s594_s28  }
   0xe   :  { %s595_s8 = smov [#allocation5]  }
   0xf   :  { %s40_s9 = sshll.u32 %s595_s8, 4  ;;  %s41_s9 = int_to_ptr.vmem [resolvable:$true] %s40_s9 }
  0x10   :  { %s554_s10 = scalar_lea.vmem %s41_s9, 2048  ;;  %p559_p6 = scmp.lt.s32.totalorder %s41_s9, %s41_s9 }
  0x11   :  { %p555_p5 = scmp.ne.s32.totalorder %s41_s9, %s554_s10  ;;  %p560_p7 = scmp.lt.s32.totalorder %s554_s10, %s554_s10 }
  0x13   :  { %p561_p8 = por %p560_p7, %p559_p6 }
  0x15   :  { %p562_p9 = pnand %p561_p8, %p555_p5 }
  0x17   :  { %565 = shalt.err (!%p562_p9)
}
  0x18   :  { %46 = dma.hbm_to_vmem [thread:$0]  %s730_s5, 2048, %s41_s9, [#allocation6], %s593_s27, %s593_s27, %s594_s28  }
  0x19   :  { %586 = dma.done.wait [#allocation3], 2048  }
  0x1a   :  { %587 = vsyncadd [#allocation3], 4294965248 }
  0x1b   :  { %588 = dma.done.wait [#allocation6], 2048  }
  0x1c   :  { %589 = vsyncadd [#allocation6], 4294965248  ;;  %v596_v0 = vmov 0   ;;  %v55_v1 = vld [vmem:[%s725_s0] sm:$0xff]  ;;  %v597_v2 = vmov 0.0   ;;  %v196_v3 = vld [vmem:[#allocation2 + $0x78] sm:$0xff] }
  0x1d   :  { %519 = vset.pattern.permute.xlu0 %v596_v0  ;;  %431 = vmatprep.subr.mxu0 %v597_v2  ;;  %v195_v4 = vld [vmem:[#allocation2 + $0x70] sm:$0xff]  ;;  %v194_v5 = vld [vmem:[#allocation2 + $0x68] sm:$0xff]  ;;  %v193_v6 = vld [vmem:[#allocation2 + $0x60] sm:$0xff]  ;;  %vm598_vm0 = vmmov 0   ;;  %v599_v37 = vmov 683565275  }
  0x1e   :  { %59 = vperm.xlu0 %519, %v55_v1   ;;  %466 = vmatprep.subr.mxu1 %v597_v2  ;;  %v192_v7 = vld [vmem:[#allocation2 + $0x58] sm:$0xff]  ;;  %v191_v8 = vld [vmem:[#allocation2 + $0x50] sm:$0xff]  ;;  %v190_v9 = vld [vmem:[#allocation2 + $0x48] sm:$0xff]  ;;  %v600_v39 = vmov 2475754826   ;;  %s605_s18 = smov [#allocation7]  }
  0x1f   :  { %432 = vmatpush3.msra.mxu0 %v196_v3  ;;  %463 = vmatprep.mubr.msk.f32.mxu0 %vm598_vm0, %v597_v2  ;;  %v189_v10 = vld [vmem:[#allocation2 + $0x40] sm:$0xff]  ;;  %v188_v11 = vld [vmem:[#allocation2 + $0x38] sm:$0xff]  ;;  %v187_v12 = vld [vmem:[#allocation2 + $0x30] sm:$0xff]  ;;  %v601_v42 = vmov 2131351028   ;;  %s379_s19 = sshll.u32 %s605_s18, 4  ;;  %s380_s19 = int_to_ptr.vmem [resolvable:$true] %s379_s19 }
  0x20   :  { %433 = vmatprep.subr.mxu0 %v597_v2  ;;  %498 = vmatprep.mubr.msk.f32.mxu1 %vm598_vm0, %v597_v2  ;;  %v186_v13 = vld [vmem:[#allocation2 + $0x28] sm:$0xff]  ;;  %v185_v14 = vld [vmem:[#allocation2 + $0x20] sm:$0xff]  ;;  %v184_v15 = vld [vmem:[#allocation2 + $0x18] sm:$0xff]  ;;  %v602_v45 = vmov 2102212464   ;;  %p571_p11 = scmp.lt.s32.totalorder %s380_s19, %s380_s19 }
  0x21   :  { %434 = vmatpush3.msra.mxu0 %v195_v4  ;;  %v183_v16 = vld [vmem:[#allocation2 + $0x10] sm:$0xff]  ;;  %v182_v17 = vld [vmem:[#allocation2 + $0x8] sm:$0xff]  ;;  %v181_v18 = vld [vmem:[#allocation2] sm:$0xff]  ;;  %v603_v48 = vmov 920167782  }
  0x22   :  { %435 = vmatprep.subr.mxu0 %v597_v2  ;;  %v294_v19 = vld [vmem:[#allocation5 + $0x78] sm:$0xff]  ;;  %v293_v20 = vld [vmem:[#allocation5 + $0x70] sm:$0xff]  ;;  %v292_v21 = vld [vmem:[#allocation5 + $0x68] sm:$0xff]  ;;  %v604_v51 = vmov 1326507024  }
  0x23   :  { %436 = vmatpush3.msra.mxu0 %v194_v5  ;;  %467 = vmatpush3.msra.mxu1 %v294_v19  ;;  %v389_v22 = vld [vmem:[%s726_s1] ss:$0 sm:$0xff] }
  0x24   :  { %437 = vmatprep.subr.mxu0 %v597_v2  ;;  %468 = vmatprep.subr.mxu1 %v597_v2  ;;  %v390_v23 = vld [vmem:[%s727_s2] ss:$0 sm:$0xff] }
  0x25   :  { %438 = vmatpush3.msra.mxu0 %v193_v6  ;;  %469 = vmatpush3.msra.mxu1 %v293_v20 }
  0x26   :  { %439 = vmatprep.subr.mxu0 %v597_v2  ;;  %470 = vmatprep.subr.mxu1 %v597_v2 }
  0x27   :  { %440 = vmatpush3.msra.mxu0 %v192_v7  ;;  %471 = vmatpush3.msra.mxu1 %v292_v21 }
  0x28   :  { %441 = vmatprep.subr.mxu0 %v597_v2  ;;  %472 = vmatprep.subr.mxu1 %v597_v2 }
  0x29   :  { %442 = vmatpush3.msra.mxu0 %v191_v8 }
  0x2a   :  { %443 = vmatprep.subr.mxu0 %v597_v2 }
  0x2b   :  { %444 = vmatpush3.msra.mxu0 %v190_v9 }
  0x2c   :  { %445 = vmatprep.subr.mxu0 %v597_v2 }
  0x2d   :  { %446 = vmatpush3.msra.mxu0 %v189_v10 }
  0x2e   :  { %447 = vmatprep.subr.mxu0 %v597_v2 }
  0x2f   :  { %448 = vmatpush3.msra.mxu0 %v188_v11 }
  0x30   :  { %449 = vmatprep.subr.mxu0 %v597_v2 }
  0x31   :  { %450 = vmatpush3.msra.mxu0 %v187_v12 }
  0x32   :  { %451 = vmatprep.subr.mxu0 %v597_v2 }
  0x33   :  { %452 = vmatpush3.msra.mxu0 %v186_v13 }
  0x34   :  { %453 = vmatprep.subr.mxu0 %v597_v2 }
  0x35   :  { %454 = vmatpush3.msra.mxu0 %v185_v14 }
  0x36   :  { %455 = vmatprep.subr.mxu0 %v597_v2 }
  0x37   :  { %456 = vmatpush3.msra.mxu0 %v184_v15 }
  0x38   :  { %457 = vmatprep.subr.mxu0 %v597_v2 }
  0x39   :  { %458 = vmatpush3.msra.mxu0 %v183_v16 }
  0x3a   :  { %459 = vmatprep.subr.mxu0 %v597_v2 }
  0x3b   :  { %460 = vmatpush3.msra.mxu0 %v182_v17 }
  0x3c   :  { %461 = vmatprep.subr.mxu0 %v597_v2 }
  0x3d   :  { %462 = vmatpush3.msra.mxu0 %v181_v18 }
  0x99   :  { %v60_v24 = vpop.permute.xlu0 %59 }
  0x9a   :  { %v68_v25 = vmul.f32 %v389_v22, %v60_v24 }
  0x9c   :  { %v683_v26 = vadd.f32 %v390_v23, %v68_v25 }
  0x9e   :  { %v80_v27 = vand.u32 2139095040, %v683_v26  ;;  %v77_v31 = vand.u32 2147483647, %v683_v26  ;;  %vm79_vm8 = vcmp.lt.s32.totalorder %v683_v26, 0  ;;  %vm169_vm13 = vweird.f32 %v683_v26 }
  0xa0   :  { %v81_v28 = vshrl.u32 %v80_v27, 23  ;;  %v84_v34 = vand.u32 8388607, %v77_v31  ;;  %vm78_vm9 = vcmp.le.f32.partialorder %v77_v31, 0.7853982 }
  0xa2   :  { %v391_v29 = vadd.s32 4294967169, %v81_v28  ;;  %v85_v53 = vor.u32 8388608, %v84_v34 }
  0xa4   :  { %v87_v30 = vadd.s32 1, %v391_v29  ;;  %v125_v4 = vshll.u32 %v85_v53, 8 }
  0xa6   :  { %vm88_vm1 = vcmp.gt.s32.totalorder %v87_v30, 0 }
  0xa7   :  { %v89_v32 = vsel %vm88_vm1, %v87_v30, 0 }
  0xa8   :  { %v91_v33 = vand.u32 31, %v89_v32  ;;  %v90_v36 = vshrl.u32 %v89_v32, 5 }
  0xaa   :  { %v92_v35 = vsub.s32 32, %v91_v33  ;;  %v94_v38 = vshll.u32 %v599_v37, %v91_v33  ;;  %v97_v40 = vshll.u32 %v600_v39, %v91_v33  ;;  %v100_v44 = vshll.u32 %v601_v42, %v91_v33 }
  0xab   :  { %v103_v47 = vshll.u32 %v602_v45, %v91_v33  ;;  %v106_v50 = vshll.u32 %v603_v48, %v91_v33  ;;  %vm109_vm2 = vcmp.lt.s32.totalorder %v90_v36, 1  ;;  %vm112_vm3 = vcmp.lt.s32.totalorder %v90_v36, 4 }
  0xac   :  { %v95_v41 = vshrl.u32 %v600_v39, %v92_v35  ;;  %v98_v43 = vshrl.u32 %v601_v42, %v92_v35  ;;  %v101_v46 = vshrl.u32 %v602_v45, %v92_v35  ;;  %v104_v49 = vshrl.u32 %v603_v48, %v92_v35 }
  0xad   :  { %v107_v52 = vshrl.u32 %v604_v51, %v92_v35  ;;  %v93_v62 = vshrl.u32 %v599_v37, %v92_v35  ;;  %vm111_vm4 = vcmp.lt.s32.totalorder %v90_v36, 3  ;;  %vm110_vm5 = vcmp.lt.s32.totalorder %v90_v36, 2 }
  0xae   :  { %v96_v54 = vor.u32 %v95_v41, %v94_v38  ;;  %v99_v55 = vor.u32 %v98_v43, %v97_v40  ;;  %v102_v56 = vor.u32 %v101_v46, %v100_v44  ;;  %v105_v57 = vor.u32 %v104_v49, %v103_v47 }
  0xaf   :  { %v108_v58 = vor.u32 %v107_v52, %v106_v50 }
  0xb0   :  { %v114_v59 = vsel %vm112_vm3, %v102_v56, 2102212464  ;;  %v117_v60 = vsel %vm109_vm2, %v96_v54, %v99_v55  ;;  %v121_v61 = vsel %vm109_vm2, %v99_v55, %v102_v56  ;;  %v118_v63 = vsel %vm112_vm3, %v105_v57, 920167782 }
  0xb1   :  { %v122_v0 = vsel %vm112_vm3, %v108_v58, 1326507024  ;;  %v119_v1 = vsel %vm111_vm4, %v102_v56, %v118_v63  ;;  %v113_v5 = vsel %vm109_vm2, %v93_v62, %v96_v54  ;;  %v115_v6 = vsel %vm111_vm4, %v99_v55, %v114_v59  ;;  %v291_v56 = vld [vmem:[#allocation5 + $0x60] sm:$0xff]  ;;  %v289_v58 = vld [vmem:[#allocation5 + $0x50] sm:$0xff]  ;;  %v288_v59 = vld [vmem:[#allocation5 + $0x48] sm:$0xff] }
  0xb2   :  { %v123_v3 = vsel %vm111_vm4, %v105_v57, %v122_v0  ;;  %v120_v7 = vsel %vm110_vm5, %v117_v60, %v119_v1  ;;  %v116_v13 = vsel %vm110_vm5, %v113_v5, %v115_v6  ;;  %473 = vmatpush3.msra.mxu1 %v291_v56  ;;  %v290_v57 = vld [vmem:[#allocation5 + $0x58] sm:$0xff]  ;;  %v284_v62 = vld [vmem:[#allocation5 + $0x28] sm:$0xff]  ;;  %v283_v63 = vld [vmem:[#allocation5 + $0x20] sm:$0xff] }
  0xb3   :  { %v124_v8 = vsel %vm110_vm5, %v121_v61, %v123_v3  ;;  %v692_v11 = vmul.u32.u64.low %v125_v4, %v120_v7  ;;  %v693_v12 = vmul.u32.u64.high %v125_v4, %v120_v7, %v692_v11  ;;  %v132_v15 = vmul.u32 %v125_v4, %v116_v13  ;;  %474 = vmatprep.subr.mxu1 %v597_v2  ;;  %v286_v60 = vld [vmem:[#allocation5 + $0x38] sm:$0xff]  ;;  %v285_v61 = vld [vmem:[#allocation5 + $0x30] sm:$0xff]  ;;  %v280_v3 = vld [vmem:[#allocation5 + $0x8] sm:$0xff] }
  0xb4   :  { %v689_v9 = vmul.u32.u64.low %v125_v4, %v124_v8  ;;  %v690_v10 = vmul.u32.u64.high %v125_v4, %v124_v8, %v689_v9  ;;  %475 = vmatpush3.msra.mxu1 %v290_v57  ;;  %v282_v0 = vld [vmem:[#allocation5 + $0x18] sm:$0xff]  ;;  %v281_v1 = vld [vmem:[#allocation5 + $0x10] sm:$0xff]  ;;  %v279_v4 = vld [vmem:[#allocation5] sm:$0xff] }
  0xb5   :  { %v135_v14 = vadd.s32 1, %v693_v12  ;;  %476 = vmatprep.subr.mxu1 %v597_v2  ;;  %v395_v5 = vld [vmem:[%s729_s4] ss:$0 sm:$0xff]  ;;  %s566_s4 = scalar_lea.vmem %s380_s19, 128 }
  0xb6   :  { %vm134_vm6 = vc.u32 %v690_v10, %v692_v11  ;;  %v133_v28 = vadd.s32 %v692_v11, %v690_v10  ;;  %477 = vmatpush3.msra.mxu1 %v289_v58  ;;  %p567_p10 = scmp.ne.s32.totalorder %s380_s19, %s566_s4  ;;  %p572_p12 = scmp.lt.s32.totalorder %s566_s4, %s566_s4 }
  0xb7   :  { %v136_v16 = vsel %vm134_vm6, %v135_v14, %v693_v12  ;;  %478 = vmatprep.subr.mxu1 %v597_v2  ;;  %v396_v14 = vld [vmem:[%s731_s6] ss:$0 sm:$0xff] }
  0xb8   :  { %v137_v17 = vadd.s32 %v136_v16, %v132_v15  ;;  %479 = vmatpush3.msra.mxu1 %v288_v59  ;;  %p573_p13 = por %p572_p12, %p571_p11 }
  0xb9   :  { %480 = vmatprep.subr.mxu1 %v597_v2 }
  0xba   :  { %v138_v18 = vadd.s32 536870912, %v137_v17  ;;  %p574_p0 = pnand %p573_p13, %p567_p10 }
  0xbc   :  { %v139_v19 = vshrl.u32 %v138_v18, 30 }
  0xbe   :  { %v140_v20 = vshll.u32 %v139_v19, 30  ;;  %v163_v44 = vsub.s32 4, %v139_v19 }
  0xc0   :  { %v141_v21 = vsub.s32 %v137_v17, %v140_v20  ;;  %v164_v45 = vsel %vm79_vm8, %v163_v44, %v139_v19 }
  0xc1   :  { %v166_v46 = vsel %vm78_vm9, 0, %v164_v45 }
  0xc2   :  { %v143_v22 = vsub.s32 0, %v141_v21  ;;  %v170_v47 = vand.u32 3, %v166_v46 }
  0xc4   :  { %v392_v23 = vmin.u32 %v143_v22, %v141_v21  ;;  %vm175_vm10 = vcmp.eq.s32.totalorder %v170_v47, 2  ;;  %vm172_vm11 = vcmp.eq.s32.totalorder %v170_v47, 0  ;;  %vm171_vm12 = vcmp.lt.s32.totalorder %v170_v47, 2 }
  0xc6   :  { %v145_v24 = vclz %v392_v23 }
  0xc8   :  { %v393_v25 = vadd.s32 4294967294, %v145_v24 }
  0xca   :  { %vm394_vm7 = vcmp.lt.s32.totalorder %v393_v25, 0 }
  0xcb   :  { %v148_v27 = vsel %vm394_vm7, 0, %v393_v25 }
  0xcc   :  { %v149_v29 = vsub.s32 32, %v148_v27  ;;  %v153_v30 = vsub.s32 4294967266, %v148_v27  ;;  %v150_v32 = vshll.u32 %v141_v21, %v148_v27 }
  0xce   :  { %v151_v33 = vshrl.u32 %v133_v28, %v149_v29  ;;  %v154_v34 = vadd.s32 127, %v153_v30 }
  0xd0   :  { %v152_v35 = vor.u32 %v151_v33, %v150_v32  ;;  %v155_v36 = vshll.u32 %v154_v34, 23 }
  0xd2   :  { %v156_v37 = vor.u32 4788187, %v155_v36  ;;  %v159_v39 = vcvt.s32.f32 %v152_v35 }
  0xd4   :  { %v157_v38 = vand.u32 2147483647, %v156_v37 }
  0xd6   :  { %v160_v40 = vmul.f32 %v159_v39, %v157_v38 }
  0xd8   :  { %v161_v41 = vxor.u32 2147483648, %v160_v40 }
  0xda   :  { %v162_v42 = vsel %vm79_vm8, %v161_v41, %v160_v40 }
  0xdb   :  { %v165_v43 = vsel %vm78_vm9, %v683_v26, %v162_v42  ;;  %v287_v26 = vld [vmem:[#allocation5 + $0x40] sm:$0xff] }
  0xdc   :  { %520 = vcosq.f32 %v165_v43  ;;  %481 = vmatpush3.msra.mxu1 %v287_v26 }
  0xdd   :  { %522 = vsinq.f32 %v165_v43  ;;  %482 = vmatprep.subr.mxu1 %v597_v2 }
  0xde   :  { %483 = vmatpush3.msra.mxu1 %v286_v60 }
  0xdf   :  { %484 = vmatprep.subr.mxu1 %v597_v2 }
  0xe0   :  { %485 = vmatpush3.msra.mxu1 %v285_v61 }
  0xe1   :  { %486 = vmatprep.subr.mxu1 %v597_v2 }
  0xe2   :  { %487 = vmatpush3.msra.mxu1 %v284_v62 }
  0xe3   :  { %488 = vmatprep.subr.mxu1 %v597_v2 }
  0xe4   :  { %489 = vmatpush3.msra.mxu1 %v283_v63 }
  0xe5   :  { %490 = vmatprep.subr.mxu1 %v597_v2 }
  0xe6   :  { %491 = vmatpush3.msra.mxu1 %v282_v0 }
  0xe7   :  { %492 = vmatprep.subr.mxu1 %v597_v2 }
  0xe8   :  { %493 = vmatpush3.msra.mxu1 %v281_v1 }
  0xe9   :  { %v521_v48 = vpop.eup %520  ;;  %494 = vmatprep.subr.mxu1 %v597_v2 }
  0xea   :  { %v523_v49 = vpop.eup %522  ;;  %v176_v50 = vxor.u32 2147483648, %v521_v48  ;;  %495 = vmatpush3.msra.mxu1 %v280_v3 }
  0xeb   :  { %v173_v51 = vxor.u32 2147483648, %v523_v49  ;;  %496 = vmatprep.subr.mxu1 %v597_v2 }
  0xec   :  { %v177_v52 = vsel %vm175_vm10, %v176_v50, %v523_v49  ;;  %497 = vmatpush3.msra.mxu1 %v279_v4 }
  0xed   :  { %v174_v53 = vsel %vm172_vm11, %v521_v48, %v173_v51 }
  0xee   :  { %v178_v31 = vsel %vm171_vm12, %v174_v53, %v177_v52 }
  0xef   :  { %v179_v54 = vsel %vm169_vm13, nan, %v178_v31 }
  0xf0   :  { %v180_v55 = vmul.f32 1.4142135, %v179_v54 }
  0xf2   :  { %464 = vmatmul.mubr.f32.vlgmr.msra.gmra.mxu0 %v180_v55 }
 0x1b2   :  { %v270_v6 = vpop.f32.mrf.mxu0 }
 0x1b3   :  { %v271_v7 = vadd.f32 %v395_v5, %v270_v6 }
 0x1b4   :  { %v465_v8 = vpop.f32.mrf.mxu0 }
 0x1b5   :  { %v274_v9 = vmul.f32 0.5, %v271_v7 }
 0x1b7   :  { %524 = vtanh.f32 %v274_v9 }
 0x1c4   :  { %v525_v10 = vpop.eup %524 }
 0x1c5   :  { %v276_v11 = vmul.f32 0.5, %v525_v10 }
 0x1c7   :  { %v277_v12 = vadd.f32 0.5, %v276_v11 }
 0x1c9   :  { %v278_v13 = vmul.f32 %v277_v12, %v271_v7 }
 0x1cb   :  { %499 = vmatmul.mubr.f32.vlgmr.msra.gmra.mxu1 %v278_v13 }
 0x28b   :  { %v368_v2 = vpop.f32.mrf.mxu1 }
 0x28c   :  { %v369_v15 = vadd.f32 %v396_v14, %v368_v2 }
 0x28d   :  { %v500_v16 = vpop.f32.mrf.mxu1 }
 0x28e   :  { %372 = vst [vmem:[#allocation7] sm:$0xff] %v369_v15 }
 0x28f   :  { %577 = shalt.err (!%p574_p0)
}
 0x290   :  { %382 = dma.vmem_to_hbm [thread:$0]  %s380_s19, 128, %s732_s7, [#allocation4]  }
 0x291   :  { %590 = dma.done.wait [#allocation4], 128  }
 0x292   :  { %591 = vsyncadd [#allocation4], 4294967168 }
 0x293   :  { %386 = vsyncpa [#allocation3], 1 }
 0x294   :  { %387 = vsyncpa [#allocation6], 1 }
 0x295   :  { %388 = vsyncpa [#allocation4], 1 }

</bundles_post_ra>
